<compile_context>
chip_gen: v7x
topology: tpu7x:2x2x1
jax: 0.10.0
libtpu: 0.0.40
codegen_flags: <defaults>
</compile_context>

<pallas_src>
import functools

import jax
import jax.numpy as jnp
from jax.experimental import pallas as pl
from jax.experimental.pallas import tpu as pltpu

_GOLDEN_U32 = 0x9E3779B9
_MIX1_U32 = 0x85EBCA6B
_MIX2_U32 = 0xC2B2AE35


def _dropout_kernel(x_ref, o_ref, *, rate: float, seed_mix: int,
                    feat: int, tile_rows: int):
    """Inverted dropout on one [tile_rows, feat] block (counter-based PRNG)."""
    shape = x_ref.shape
    row0 = pl.program_id(0) * tile_rows

    # Global linear element index -> unique 32-bit counter (tiling-invariant).
    rows = jax.lax.broadcasted_iota(jnp.int32, shape, 0) + row0
    cols = jax.lax.broadcasted_iota(jnp.int32, shape, 1)
    h = (rows * feat + cols).astype(jnp.uint32) ^ jnp.uint32(seed_mix)

    # murmur3 fmix32 finalizer: pure 32-bit VPU xor/shift/mul, no HW PRNG.
    h = h ^ (h >> 16)
    h = h * jnp.uint32(_MIX1_U32)
    h = h ^ (h >> 13)
    h = h * jnp.uint32(_MIX2_U32)
    h = h ^ (h >> 16)

    # keep element  <=>  uniform_31bit >= rate * 2^31   (signed-safe compare)
    r = (h >> 1).astype(jnp.int32)                     # value in [0, 2^31)
    thresh = min(int(rate * float(1 << 31)), (1 << 31) - 1)
    keep = r >= jnp.int32(thresh)

    x = x_ref[...]
    scale = jnp.asarray(1.0 / (1.0 - rate), dtype=x.dtype)  # stay in input dtype
    o_ref[...] = jnp.where(keep, x * scale, jnp.zeros_like(x)).astype(o_ref.dtype)


def _pick_tile_rows(batch: int, row_bytes: int, target_bytes: int = 2 << 20) -> int:
    """Largest row tile (multiple of 8, or the full batch) within ~target_bytes.

    ~2 MiB per block * 2 arrays (in/out) * 2 pipeline buffers ~= 8 MiB resident,
    well under the 32 MiB scoped-VMEM default on v5e/v6e/v7x.
    """
    if batch <= 8:
        return batch
    cap = max(8, (target_bytes // max(1, row_bytes)) // 8 * 8)
    if cap >= batch:
        return batch          # whole array in one (small) block; full-dim is legal
    return int(cap)


class PallasLayer:
    """JAX/Pallas equivalent of the (abstract) PyTorch `Layer` base class."""

    def __init__(self, in_size: int, out_size: int, dropout: float = 0.0, seed: int = 0):
        self.in_size = in_size
        self.out_size = out_size
        self.dropout_rate = float(dropout)
        self.seed = int(seed)
        # No trainable parameters are declared in the reference __init__.

    def __call__(self, x: jnp.ndarray, train: bool = True) -> jnp.ndarray:
        assert x.ndim == 2 and x.shape[1] == self.in_size, (
            f"expected [batch, {self.in_size}], got {x.shape}")

        # No dropout submodule (p == 0) or eval mode -> identity, zero HBM traffic.
        if self.dropout_rate <= 0.0 or not train:
            return x
        # Degenerate p >= 1: everything is dropped (avoids inf scale).
        if self.dropout_rate >= 1.0:
            return jnp.zeros_like(x)

        batch, feat = x.shape
        dsize = x.dtype.itemsize
        tile_rows = _pick_tile_rows(batch, feat * dsize)
        grid = (pl.cdiv(batch, tile_rows),)

        seed_mix = (self.seed * _GOLDEN_U32) & 0xFFFFFFFF
        kernel = functools.partial(
            _dropout_kernel, rate=self.dropout_rate, seed_mix=seed_mix,
            feat=feat, tile_rows=tile_rows)

        return pl.pallas_call(
            kernel,
            out_shape=jax.ShapeDtypeStruct(x.shape, x.dtype),
            grid=grid,
            in_specs=[pl.BlockSpec((tile_rows, feat), lambda i: (i, 0))],
            out_specs=pl.BlockSpec((tile_rows, feat), lambda i: (i, 0)),
            compiler_params=pltpu.CompilerParams(
                # Stateless per-element hash -> safe to shard across TCs (v7x).
                dimension_semantics=("parallel",)),
            cost_estimate=pl.CostEstimate(
                flops=batch * feat,
                transcendentals=0,
                bytes_accessed=2 * batch * feat * dsize),
        )(x)


if __name__ == "__main__":
    key = jax.random.PRNGKey(0)

    batch, in_size, out_size = 16, 128, 64
    x = jax.random.normal(key, (batch, in_size), dtype=jnp.float32)

    # dropout > 0 path (the only concrete compute in the reference __init__)
    layer = PallasLayer(in_size, out_size, dropout=0.25, seed=0)
    y = jax.block_until_ready(layer(x))
    assert y.shape == x.shape and y.dtype == x.dtype

    # sanity: kept elements are exactly x / (1 - p); dropped elements are zero
    scale = 1.0 / (1.0 - 0.25)
    assert bool(jnp.allclose(jnp.where(y != 0.0, y, x * scale), x * scale,
                             rtol=1e-6, atol=1e-6))
    drop_frac = float(jnp.mean((y == 0.0).astype(jnp.float32)))
    assert 0.05 < drop_frac < 0.50, f"unexpected drop fraction {drop_frac}"

    # dropout == 0 path: identity (no kernel, no HBM traffic)
    layer0 = PallasLayer(in_size, out_size, dropout=0.0)
    y0 = jax.block_until_ready(layer0(x))
    assert bool(jnp.array_equal(y0, x))

    print("KERNEL_OK")
</pallas_src>

<mosaic_0001>
module attributes {stable_mosaic.version = 11 : i64} {
  func.func @_dropout_kernel(%arg0: i32, %arg1: memref<16x128xf32, #tpu.memory_space<vmem>>, %arg2: memref<16x128xf32, #tpu.memory_space<vmem>>) attributes {dimension_semantics = [#tpu.dimension_semantics<parallel>], iteration_bounds = array<i64: 1>, scalar_prefetch = 0 : i64, scratch_operands = 0 : i64, tpu.core_type = #tpu.core_type<tc>, window_params = [{transform_indices = @transform_0, window_bounds = array<i64: 16, 128>}, {transform_indices = @transform_1, window_bounds = array<i64: 16, 128>}]} {
    %c16_i32 = arith.constant 16 : i32
    %0 = arith.muli %arg0, %c16_i32 : i32
    %1 = tpu.iota {dimensions = array<i32: 0>} : vector<16x128xi32>
    %2 = vector.broadcast %0 : i32 to vector<16x128xi32>
    %3 = arith.addi %1, %2 : vector<16x128xi32>
    %4 = tpu.iota {dimensions = array<i32: 1>} : vector<16x128xi32>
    %c128_i32 = arith.constant 128 : i32
    %5 = vector.broadcast %c128_i32 : i32 to vector<16x128xi32>
    %6 = arith.muli %3, %5 : vector<16x128xi32>
    %7 = arith.addi %6, %4 : vector<16x128xi32>
    %c0_i32 = arith.constant 0 : i32
    %8 = vector.broadcast %c0_i32 : i32 to vector<16x128xi32>
    %9 = arith.xori %7, %8 : vector<16x128xi32>
    %c16_i32_0 = arith.constant 16 : i32
    %10 = vector.broadcast %c16_i32_0 : i32 to vector<16x128xi32>
    %11 = arith.shrui %9, %10 : vector<16x128xi32>
    %12 = arith.xori %9, %11 : vector<16x128xi32>
    %c-2048144789_i32 = arith.constant -2048144789 : i32
    %13 = vector.broadcast %c-2048144789_i32 : i32 to vector<16x128xi32>
    %14 = arith.muli %12, %13 : vector<16x128xi32>
    %c13_i32 = arith.constant 13 : i32
    %15 = vector.broadcast %c13_i32 : i32 to vector<16x128xi32>
    %16 = arith.shrui %14, %15 : vector<16x128xi32>
    %17 = arith.xori %14, %16 : vector<16x128xi32>
    %c-1028477387_i32 = arith.constant -1028477387 : i32
    %18 = vector.broadcast %c-1028477387_i32 : i32 to vector<16x128xi32>
    %19 = arith.muli %17, %18 : vector<16x128xi32>
    %c16_i32_1 = arith.constant 16 : i32
    %20 = vector.broadcast %c16_i32_1 : i32 to vector<16x128xi32>
    %21 = arith.shrui %19, %20 : vector<16x128xi32>
    %22 = arith.xori %19, %21 : vector<16x128xi32>
    %c1_i32 = arith.constant 1 : i32
    %23 = vector.broadcast %c1_i32 : i32 to vector<16x128xi32>
    %24 = arith.shrui %22, %23 : vector<16x128xi32>
    %c536870912_i32 = arith.constant 536870912 : i32
    %25 = vector.broadcast %c536870912_i32 : i32 to vector<16x128xi32>
    %26 = arith.cmpi sge, %24, %25 : vector<16x128xi32>
    %c0 = arith.constant 0 : index
    %c0_2 = arith.constant 0 : index
    %27 = vector.load %arg1[%c0, %c0_2] : memref<16x128xf32, #tpu.memory_space<vmem>>, vector<16x128xf32>
    %cst = arith.constant 1.33333337 : f32
    %28 = vector.broadcast %cst : f32 to vector<16x128xf32>
    %29 = arith.mulf %27, %28 : vector<16x128xf32>
    %cst_3 = arith.constant 0.000000e+00 : f32
    %30 = vector.broadcast %cst_3 : f32 to vector<16x128xf32>
    %31 = arith.select %26, %29, %30 : vector<16x128xi1>, vector<16x128xf32>
    %c0_4 = arith.constant 0 : index
    %c0_5 = arith.constant 0 : index
    %32 = vector.load %arg2[%c0_4, %c0_5] : memref<16x128xf32, #tpu.memory_space<vmem>>, vector<16x128xf32>
    tpu.vector_store %arg2[%c0_4, %c0_5], %31 {strides = array<i32>} : memref<16x128xf32, #tpu.memory_space<vmem>>, vector<16x128xf32>,
    return
  }
  func.func @transform_0(%arg0: i32) -> (i32, i32) {
    %c0_i32 = arith.constant 0 : i32
    %c0_i32_0 = arith.constant 0 : i32
    return %arg0, %c0_i32 : i32, i32
  }
  func.func @transform_1(%arg0: i32) -> (i32, i32) {
    %c0_i32 = arith.constant 0 : i32
    %c0_i32_0 = arith.constant 0 : i32
    return %arg0, %c0_i32 : i32, i32
  }
}

</mosaic_0001>

<bundles_post_ra>
// kernel: tpu_custom_call.1
= control target key start
LH: loop header
LB: loop body
LE: loop exit
PB: predicated region body
PF: predicated region fallthrough
CT: control target
= control target key end

     0   :  { %6 = vsyncpa [#allocation3], 0  ;;  %s177_s0 = inlined_call_operand.hbm [shape: f32[16,128], index: 0, kind: input, shape index: {}]   ;;  %s178_s1 = inlined_call_operand.hbm [shape: f32[16,128], index: 1, kind: output, shape index: {}]  }
   0x1   :  { %7 = vsyncpa [#allocation4], 0  ;;  %s133_s6 = smov [#allocation2]   ;;  %s85_s10 = scalar_lea.hbm %s177_s0, 256 }
   0x2   :  { %s13_s7 = sshll.u32 %s133_s6, 4  ;;  %p86_p0 = scmp.ne.s32.totalorder %s177_s0, %s85_s10  ;;  %s14_s7 = int_to_ptr.vmem [resolvable:$true] %s13_s7 }
   0x3   :  { %p89_p1 = scmp.lt.u32.totalorder %s85_s10, %s177_s0 }
   0x5   :  { %p91_p2 = pnand %p89_p1, %p86_p0 }
   0x7   :  { %94 = shalt.err (!%p91_p2)
}
   0x8   :  { %s95_s15 = scalar_lea.vmem %s14_s7, 256  ;;  %p100_p4 = scmp.lt.s32.totalorder %s14_s7, %s14_s7 }
   0x9   :  { %p96_p3 = scmp.ne.s32.totalorder %s14_s7, %s95_s15  ;;  %p101_p5 = scmp.lt.s32.totalorder %s95_s15, %s95_s15 }
   0xb   :  { %p102_p6 = por %p101_p5, %p100_p4 }
   0xd   :  { %p103_p7 = pnand %p102_p6, %p96_p3 }
   0xf   :  { %106 = shalt.err (!%p103_p7)
}
  0x10   :  { %s134_s16 = smov 128   ;;  %s135_s17 = smov 8  }
  0x11   :  { %19 = dma.hbm_to_vmem [thread:$0]  %s177_s0, 256, %s14_s7, [#allocation3], %s134_s16, %s134_s16, %s135_s17  }
  0x12   :  { %129 = dma.done.wait [#allocation3], 256  }
  0x13   :  { %130 = vsyncadd [#allocation3], 4294967040  ;;  %v24_v0 = vlaneseq  ;;  %v56_v20 = vld [vmem:[#allocation2] sm:$0xff]  ;;  %v57_v24 = vld [vmem:[#allocation2 + $0x8] sm:$0xff]  ;;  %s136_s0 = smov [#allocation5]  }
  0x14   :  { %v58_v25 = vmul.f32 1.3333334, %v56_v20  ;;  %v59_v28 = vmul.f32 1.3333334, %v57_v24  ;;  %s69_s20 = sshll.u32 %s136_s0, 4  ;;  %s70_s20 = int_to_ptr.vmem [resolvable:$true] %s69_s20 }
  0x15   :  { %v25_v1 = vshrl.u32 %v24_v0, 7  ;;  %v31_v2 = vand.u32 127, %v24_v0  ;;  %s107_s21 = scalar_lea.vmem %s70_s20, 256  ;;  %p112_p9 = scmp.lt.s32.totalorder %s70_s20, %s70_s20 }
  0x16   :  { %p108_p8 = scmp.ne.s32.totalorder %s70_s20, %s107_s21  ;;  %p113_p10 = scmp.lt.s32.totalorder %s107_s21, %s107_s21 }
  0x17   :  { %v32_v3 = vmul.u32 128, %v25_v1  ;;  %v26_v4 = vadd.s32 8, %v25_v1 }
  0x18   :  { %p114_p11 = por %p113_p10, %p112_p9 }
  0x19   :  { %v34_v5 = vadd.s32 %v32_v3, %v31_v2  ;;  %v33_v6 = vmul.u32 128, %v26_v4 }
  0x1a   :  { %p115_p12 = pnand %p114_p11, %p108_p8 }
  0x1b   :  { %v36_v7 = vshrl.u32 %v34_v5, 16  ;;  %v35_v8 = vadd.s32 %v33_v6, %v31_v2 }
  0x1d   :  { %v38_v9 = vxor.u32 %v36_v7, %v34_v5  ;;  %v37_v10 = vshrl.u32 %v35_v8, 16 }
  0x1f   :  { %v40_v11 = vmul.u32 2246822507, %v38_v9  ;;  %v39_v12 = vxor.u32 %v37_v10, %v35_v8 }
  0x21   :  { %v42_v13 = vshrl.u32 %v40_v11, 13  ;;  %v41_v14 = vmul.u32 2246822507, %v39_v12 }
  0x23   :  { %v44_v15 = vxor.u32 %v42_v13, %v40_v11  ;;  %v43_v16 = vshrl.u32 %v41_v14, 13 }
  0x25   :  { %v46_v17 = vmul.u32 3266489909, %v44_v15  ;;  %v45_v18 = vxor.u32 %v43_v16, %v41_v14 }
  0x27   :  { %v48_v19 = vshrl.u32 %v46_v17, 16  ;;  %v47_v21 = vmul.u32 3266489909, %v45_v18 }
  0x29   :  { %v50_v22 = vxor.u32 %v48_v19, %v46_v17  ;;  %v49_v23 = vshrl.u32 %v47_v21, 16 }
  0x2b   :  { %v52_v26 = vshrl.u32 %v50_v22, 1  ;;  %v51_v27 = vxor.u32 %v49_v23, %v47_v21 }
  0x2d   :  { %vm54_vm0 = vcmp.ge.s32.totalorder %v52_v26, 536870912  ;;  %v53_v29 = vshrl.u32 %v51_v27, 1 }
  0x2e   :  { %v60_v30 = vsel %vm54_vm0, %v58_v25, 0.0 }
  0x2f   :  { %62 = vst [vmem:[#allocation5] sm:$0xff] %v60_v30  ;;  %vm55_vm1 = vcmp.ge.s32.totalorder %v53_v29, 536870912 }
  0x30   :  { %v61_v31 = vsel %vm55_vm1, %v59_v28, 0.0 }
  0x31   :  { %63 = vst [vmem:[#allocation5 + $0x8] sm:$0xff] %v61_v31 }
  0x32   :  { %118 = shalt.err (!%p115_p12)
}
  0x33   :  { %s119_s24 = scalar_lea.hbm %s178_s1, 256 }
  0x34   :  { %p120_p13 = scmp.ne.s32.totalorder %s178_s1, %s119_s24  ;;  %p123_p0 = scmp.lt.u32.totalorder %s119_s24, %s178_s1 }
  0x36   :  { %p125_p1 = pnand %p123_p0, %p120_p13 }
  0x38   :  { %128 = shalt.err (!%p125_p1)
}
  0x39   :  { %75 = dma.vmem_to_hbm [thread:$0]  %s70_s20, 256, %s178_s1, [#allocation4], %s134_s16, %s134_s16, %s135_s17  }
  0x3a   :  { %131 = dma.done.wait [#allocation4], 256  }
  0x3b   :  { %132 = vsyncadd [#allocation4], 4294967040 }
  0x3c   :  { %79 = vsyncpa [#allocation3], 1 }
  0x3d   :  { %80 = vsyncpa [#allocation4], 1 }

</bundles_post_ra>
